<compile_context>
chip_gen: v6e
topology: v6e:2x2x1
jax: 0.10.0
libtpu: 0.0.40
codegen_flags: <defaults>
</compile_context>

<pallas_src>
import functools
import math

import jax
import jax.numpy as jnp
from jax import lax
from jax.experimental import pallas as pl
from jax.experimental.pallas import tpu as pltpu


def _encoder_layer_kernel(x_ref, wqkv_ref, bqkv_ref, wo_ref, bo_ref,
                          ln1w_ref, ln1b_ref, w1_ref, b1_ref, w2_ref, b2_ref,
                          ln2w_ref, ln2b_ref, out_ref, *, num_heads, eps):
    """One batch-block: MHA -> add&LN -> FFN(ReLU) -> add&LN."""
    BB, S, D = x_ref.shape
    H = num_heads
    Dh = D // H
    scale = 1.0 / math.sqrt(Dh)

    x = x_ref[...].astype(jnp.float32)          # (BB, S, D)
    x2 = x.reshape(BB * S, D)                   # lane-dense 2-D view for the MXU

    # ---- fused QKV projection: one (BB*S, D) x (D, 3D) matmul ----
    qkv = (jnp.dot(x2, wqkv_ref[...], preferred_element_type=jnp.float32)
           + bqkv_ref[...])                     # (BB*S, 3D)

    wo = wo_ref[...]                            # (D, D), loaded once

    # ---- multi-head self attention (static head loop, static lane slices) ----
    attn2 = jnp.zeros((BB * S, D), jnp.float32)
    for h in range(H):
        q = qkv[:, h * Dh:(h + 1) * Dh].reshape(BB, S, Dh)
        k = qkv[:, D + h * Dh:D + (h + 1) * Dh].reshape(BB, S, Dh)
        v = qkv[:, 2 * D + h * Dh:2 * D + (h + 1) * Dh].reshape(BB, S, Dh)
        s = jnp.einsum('bqe,bke->bqk', q, k,
                       preferred_element_type=jnp.float32) * scale
        s = s - jnp.max(s, axis=-1, keepdims=True)
        p = jnp.exp(s)
        p = p / jnp.sum(p, axis=-1, keepdims=True)
        o = jnp.einsum('bqk,bke->bqe', p, v,
                       preferred_element_type=jnp.float32).reshape(BB * S, Dh)
        # out-proj accumulated per head (avoids in-kernel head concat)
        attn2 = attn2 + jnp.dot(o, wo[h * Dh:(h + 1) * Dh, :],
                                preferred_element_type=jnp.float32)
    attn2 = attn2 + bo_ref[...]

    # ---- residual + LayerNorm 1 (dropout is identity at inference) ----
    y = x2 + attn2
    mu = jnp.mean(y, axis=-1, keepdims=True)
    var = jnp.mean(jnp.square(y - mu), axis=-1, keepdims=True)
    y = (y - mu) * lax.rsqrt(var + eps) * ln1w_ref[...] + ln1b_ref[...]

    # ---- feed-forward: Linear -> ReLU -> Linear ----
    hdd = jnp.maximum(
        jnp.dot(y, w1_ref[...], preferred_element_type=jnp.float32) + b1_ref[...],
        0.0)
    ff = jnp.dot(hdd, w2_ref[...], preferred_element_type=jnp.float32) + b2_ref[...]

    # ---- residual + LayerNorm 2 ----
    z = y + ff
    mu2 = jnp.mean(z, axis=-1, keepdims=True)
    var2 = jnp.mean(jnp.square(z - mu2), axis=-1, keepdims=True)
    z = (z - mu2) * lax.rsqrt(var2 + eps) * ln2w_ref[...] + ln2b_ref[...]

    out_ref[...] = z.reshape(BB, S, D).astype(out_ref.dtype)


def self_att_forward(params, user_fea, item_fea, *, num_heads, block_b=None):
    """user_fea: (B, Su, D), item_fea: (B, Si, D) -> (B, Su+Si, D)."""
    fea = jnp.concatenate([user_fea, item_fea], axis=1)     # (B, S, D), batch-first
    B, S, D = fea.shape
    H = num_heads
    assert D % H == 0

    # torch parameter layout -> kernel layout (all transposes done once here;
    # constant index_maps keep the weights resident in VMEM across grid steps).
    w_qkv = params['in_proj_weight'].T                       # (D, 3D)
    b_qkv = params['in_proj_bias'].reshape(1, 3 * D)
    wo = params['out_proj_weight'].T                         # (D, D)
    bo = params['out_proj_bias'].reshape(1, D)
    w1 = params['linear1_weight'].T                          # (D, F)
    b1 = params['linear1_bias'].reshape(1, -1)
    w2 = params['linear2_weight'].T                          # (F, D)
    b2 = params['linear2_bias'].reshape(1, D)
    ln1w = params['ln1_weight'].reshape(1, D)
    ln1b = params['ln1_bias'].reshape(1, D)
    ln2w = params['ln2_weight'].reshape(1, D)
    ln2b = params['ln2_bias'].reshape(1, D)
    F = w1.shape[1]

    # Block over the batch: several sequences per grid step (bigger lane-dense
    # matmuls), but >= 2 grid steps when possible so both cores get work.
    if block_b is None:
        block_b = B // 2 if (B >= 4 and B % 2 == 0) else B
    assert B % block_b == 0
    grid = (B // block_b,)

    kern = functools.partial(_encoder_layer_kernel, num_heads=H, eps=1e-5)

    return pl.pallas_call(
        kern,
        out_shape=jax.ShapeDtypeStruct((B, S, D), jnp.float32),
        grid=grid,
        in_specs=[
            pl.BlockSpec((block_b, S, D), lambda b: (b, 0, 0)),   # activations
            pl.BlockSpec((D, 3 * D), lambda b: (0, 0)),           # W_qkv
            pl.BlockSpec((1, 3 * D), lambda b: (0, 0)),           # b_qkv
            pl.BlockSpec((D, D), lambda b: (0, 0)),               # W_out
            pl.BlockSpec((1, D), lambda b: (0, 0)),               # b_out
            pl.BlockSpec((1, D), lambda b: (0, 0)),               # ln1 gamma
            pl.BlockSpec((1, D), lambda b: (0, 0)),               # ln1 beta
            pl.BlockSpec((D, F), lambda b: (0, 0)),               # W1
            pl.BlockSpec((1, F), lambda b: (0, 0)),               # b1
            pl.BlockSpec((F, D), lambda b: (0, 0)),               # W2
            pl.BlockSpec((1, D), lambda b: (0, 0)),               # b2
            pl.BlockSpec((1, D), lambda b: (0, 0)),               # ln2 gamma
            pl.BlockSpec((1, D), lambda b: (0, 0)),               # ln2 beta
        ],
        out_specs=pl.BlockSpec((block_b, S, D), lambda b: (b, 0, 0)),
        compiler_params=pltpu.CompilerParams(
            dimension_semantics=("parallel",)),
    )(fea, w_qkv, b_qkv, wo, bo, ln1w, ln1b, w1, b1, w2, b2, ln2w, ln2b)


def init_params(key, dim, num_heads, dim_feedforward=128):
    """Deterministic params in torch layout (TransformerEncoderLayer)."""
    ks = jax.random.split(key, 8)

    def u(k, shape, bound):
        return jax.random.uniform(k, shape, minval=-bound, maxval=bound,
                                  dtype=jnp.float32)

    bd = 1.0 / math.sqrt(dim)
    bf = 1.0 / math.sqrt(dim_feedforward)
    return dict(
        in_proj_weight=u(ks[0], (3 * dim, dim), bd),
        in_proj_bias=u(ks[1], (3 * dim,), bd),
        out_proj_weight=u(ks[2], (dim, dim), bd),
        out_proj_bias=u(ks[3], (dim,), bd),
        linear1_weight=u(ks[4], (dim_feedforward, dim), bd),
        linear1_bias=u(ks[5], (dim_feedforward,), bd),
        linear2_weight=u(ks[6], (dim, dim_feedforward), bf),
        linear2_bias=u(ks[7], (dim,), bf),
        ln1_weight=jnp.ones((dim,), jnp.float32),
        ln1_bias=jnp.zeros((dim,), jnp.float32),
        ln2_weight=jnp.ones((dim,), jnp.float32),
        ln2_bias=jnp.zeros((dim,), jnp.float32),
    )


# ---------------- pure-JAX reference (torch semantics, post-norm, eval) ----------------
def _layer_norm(x, w, b, eps=1e-5):
    mu = jnp.mean(x, axis=-1, keepdims=True)
    var = jnp.mean(jnp.square(x - mu), axis=-1, keepdims=True)
    return (x - mu) / jnp.sqrt(var + eps) * w + b


def _reference_self_att(params, user_fea, item_fea, num_heads):
    x = jnp.concatenate([user_fea, item_fea], axis=1)
    B, S, D = x.shape
    H, Dh = num_heads, D // num_heads
    w_in, b_in = params['in_proj_weight'], params['in_proj_bias']
    q = x @ w_in[:D].T + b_in[:D]
    k = x @ w_in[D:2 * D].T + b_in[D:2 * D]
    v = x @ w_in[2 * D:].T + b_in[2 * D:]
    qh = q.reshape(B, S, H, Dh).transpose(0, 2, 1, 3)
    kh = k.reshape(B, S, H, Dh).transpose(0, 2, 1, 3)
    vh = v.reshape(B, S, H, Dh).transpose(0, 2, 1, 3)
    s = jnp.einsum('bhqe,bhke->bhqk', qh, kh) / math.sqrt(Dh)
    p = jax.nn.softmax(s, axis=-1)
    o = jnp.einsum('bhqk,bhke->bhqe', p, vh).transpose(0, 2, 1, 3).reshape(B, S, D)
    attn = o @ params['out_proj_weight'].T + params['out_proj_bias']
    y = _layer_norm(x + attn, params['ln1_weight'], params['ln1_bias'])
    ff = jnp.maximum(y @ params['linear1_weight'].T + params['linear1_bias'], 0.0)
    ff = ff @ params['linear2_weight'].T + params['linear2_bias']
    return _layer_norm(y + ff, params['ln2_weight'], params['ln2_bias'])


if __name__ == "__main__":
    # Small shapes consistent with SelfAtt(dim, num_heads): dim divisible by heads.
    dim, num_heads, dim_ff = 32, 4, 128
    batch, seq_u, seq_i = 4, 4, 4

    key = jax.random.PRNGKey(0)
    pkey, ukey, ikey = jax.random.split(key, 3)
    params = init_params(pkey, dim, num_heads, dim_ff)
    user_fea = jax.random.normal(ukey, (batch, seq_u, dim), dtype=jnp.float32)
    item_fea = jax.random.normal(ikey, (batch, seq_i, dim), dtype=jnp.float32)

    out = self_att_forward(params, user_fea, item_fea, num_heads=num_heads)
    out = jax.block_until_ready(out)
    assert out.shape == (batch, seq_u + seq_i, dim)

    ref = _reference_self_att(params, user_fea, item_fea, num_heads)
    assert jnp.allclose(out, ref, atol=1e-4, rtol=1e-4), \
        f"max abs err {jnp.max(jnp.abs(out - ref))}"

    print("KERNEL_OK")
</pallas_src>

<mosaic_0001>
module attributes {stable_mosaic.version = 11 : i64} {
  func.func @_encoder_layer_kernel(%arg0: i32, %arg1: memref<2x8x32xf32, #tpu.memory_space<vmem>>, %arg2: memref<32x96xf32, #tpu.memory_space<vmem>>, %arg3: memref<1x96xf32, #tpu.memory_space<vmem>>, %arg4: memref<32x32xf32, #tpu.memory_space<vmem>>, %arg5: memref<1x32xf32, #tpu.memory_space<vmem>>, %arg6: memref<1x32xf32, #tpu.memory_space<vmem>>, %arg7: memref<1x32xf32, #tpu.memory_space<vmem>>, %arg8: memref<32x128xf32, #tpu.memory_space<vmem>>, %arg9: memref<1x128xf32, #tpu.memory_space<vmem>>, %arg10: memref<128x32xf32, #tpu.memory_space<vmem>>, %arg11: memref<1x32xf32, #tpu.memory_space<vmem>>, %arg12: memref<1x32xf32, #tpu.memory_space<vmem>>, %arg13: memref<1x32xf32, #tpu.memory_space<vmem>>, %arg14: memref<2x8x32xf32, #tpu.memory_space<vmem>>) attributes {dimension_semantics = [#tpu.dimension_semantics<parallel>], iteration_bounds = array<i64: 2>, scalar_prefetch = 0 : i64, scratch_operands = 0 : i64, tpu.core_type = #tpu.core_type<tc>, window_params = [{transform_indices = @transform_0, window_bounds = array<i64: 2, 8, 32>}, {pipeline_mode = #tpu.pipeline_mode<synchronous>, transform_indices = @transform_1, window_bounds = array<i64: 32, 96>}, {pipeline_mode = #tpu.pipeline_mode<synchronous>, transform_indices = @transform_2, window_bounds = array<i64: 1, 96>}, {pipeline_mode = #tpu.pipeline_mode<synchronous>, transform_indices = @transform_3, window_bounds = array<i64: 32, 32>}, {pipeline_mode = #tpu.pipeline_mode<synchronous>, transform_indices = @transform_4, window_bounds = array<i64: 1, 32>}, {pipeline_mode = #tpu.pipeline_mode<synchronous>, transform_indices = @transform_5, window_bounds = array<i64: 1, 32>}, {pipeline_mode = #tpu.pipeline_mode<synchronous>, transform_indices = @transform_6, window_bounds = array<i64: 1, 32>}, {pipeline_mode = #tpu.pipeline_mode<synchronous>, transform_indices = @transform_7, window_bounds = array<i64: 32, 128>}, {pipeline_mode = #tpu.pipeline_mode<synchronous>, transform_indices = @transform_8, window_bounds = array<i64: 1, 128>}, {pipeline_mode = #tpu.pipeline_mode<synchronous>, transform_indices = @transform_9, window_bounds = array<i64: 128, 32>}, {pipeline_mode = #tpu.pipeline_mode<synchronous>, transform_indices = @transform_10, window_bounds = array<i64: 1, 32>}, {pipeline_mode = #tpu.pipeline_mode<synchronous>, transform_indices = @transform_11, window_bounds = array<i64: 1, 32>}, {pipeline_mode = #tpu.pipeline_mode<synchronous>, transform_indices = @transform_12, window_bounds = array<i64: 1, 32>}, {transform_indices = @transform_13, window_bounds = array<i64: 2, 8, 32>}]} {
    %c0 = arith.constant 0 : index
    %c0_0 = arith.constant 0 : index
    %c0_1 = arith.constant 0 : index
    %0 = vector.load %arg1[%c0, %c0_0, %c0_1] : memref<2x8x32xf32, #tpu.memory_space<vmem>>, vector<2x8x32xf32>
    %1 = vector.shape_cast %0 : vector<2x8x32xf32> to vector<16x32xf32>
    %c0_2 = arith.constant 0 : index
    %c0_3 = arith.constant 0 : index
    %2 = vector.load %arg2[%c0_2, %c0_3] : memref<32x96xf32, #tpu.memory_space<vmem>>, vector<32x96xf32>
    %cst = arith.constant dense<0.000000e+00> : vector<16x96xf32>
    %3 = tpu.matmul %1, %2, %cst {dimension_numbers = #tpu.dot_dimension_numbers<[1], [0], [0], [1], [0, 0, 1, 1], [], []>} : vector<16x32xf32>, vector<32x96xf32>, vector<16x96xf32> -> vector<16x96xf32>
    %c0_4 = arith.constant 0 : index
    %c0_5 = arith.constant 0 : index
    %4 = vector.load %arg3[%c0_4, %c0_5] : memref<1x96xf32, #tpu.memory_space<vmem>>, vector<1x96xf32>
    %5 = vector.broadcast %4 : vector<1x96xf32> to vector<16x96xf32>
    %6 = arith.addf %3, %5 : vector<16x96xf32>
    %c0_6 = arith.constant 0 : index
    %c0_7 = arith.constant 0 : index
    %7 = vector.load %arg4[%c0_6, %c0_7] : memref<32x32xf32, #tpu.memory_space<vmem>>, vector<32x32xf32>
    %cst_8 = arith.constant 0.000000e+00 : f32
    %8 = vector.broadcast %cst_8 : f32 to vector<16x32xf32>
    %9 = vector.extract_strided_slice %6 {offsets = [0, 0], sizes = [16, 8], strides = [1, 1]} : vector<16x96xf32> to vector<16x8xf32>
    %10 = vector.shape_cast %9 : vector<16x8xf32> to vector<2x8x8xf32>
    %11 = vector.extract_strided_slice %6 {offsets = [0, 32], sizes = [16, 8], strides = [1, 1]} : vector<16x96xf32> to vector<16x8xf32>
    %12 = vector.shape_cast %11 : vector<16x8xf32> to vector<2x8x8xf32>
    %13 = vector.extract_strided_slice %6 {offsets = [0, 64], sizes = [16, 8], strides = [1, 1]} : vector<16x96xf32> to vector<16x8xf32>
    %14 = vector.shape_cast %13 : vector<16x8xf32> to vector<2x8x8xf32>
    "tpu.trace_start"() <{level = 10 : i32, message = "bqe,bke->bqk"}> : () -> ()
    %cst_9 = arith.constant dense<0.000000e+00> : vector<2x8x8xf32>
    %15 = tpu.matmul %10, %12, %cst_9 {dimension_numbers = #tpu.dot_dimension_numbers<[2], [2], [1], [1], [0, 0, 0, 1, 1, 1], [0], [0]>} : vector<2x8x8xf32>, vector<2x8x8xf32>, vector<2x8x8xf32> -> vector<2x8x8xf32>
    "tpu.trace_stop"() : () -> ()
    %cst_10 = arith.constant 0.353553385 : f32
    %16 = vector.broadcast %cst_10 : f32 to vector<2x8x8xf32>
    %17 = arith.mulf %15, %16 : vector<2x8x8xf32>
    %cst_11 = arith.constant dense<0xFF800000> : vector<2x8xf32>
    %18 = vector.multi_reduction <maximumf>, %17, %cst_11 [2] : vector<2x8x8xf32> to vector<2x8xf32>
    %19 = vector.shape_cast %18 : vector<2x8xf32> to vector<2x8x1xf32>
    %20 = vector.broadcast %19 : vector<2x8x1xf32> to vector<2x8x8xf32>
    %21 = arith.subf %17, %20 : vector<2x8x8xf32>
    %22 = math.exp %21 : vector<2x8x8xf32>
    %cst_12 = arith.constant dense<0.000000e+00> : vector<2x8xf32>
    %23 = vector.multi_reduction <add>, %22, %cst_12 [2] : vector<2x8x8xf32> to vector<2x8xf32>
    %24 = vector.shape_cast %23 : vector<2x8xf32> to vector<2x8x1xf32>
    %25 = vector.broadcast %24 : vector<2x8x1xf32> to vector<2x8x8xf32>
    %26 = arith.divf %22, %25 : vector<2x8x8xf32>
    "tpu.trace_start"() <{level = 10 : i32, message = "bqk,bke->bqe"}> : () -> ()
    %cst_13 = arith.constant dense<0.000000e+00> : vector<2x8x8xf32>
    %27 = tpu.matmul %26, %14, %cst_13 {dimension_numbers = #tpu.dot_dimension_numbers<[2], [1], [1], [2], [0, 0, 0, 1, 1, 2], [0], [0]>} : vector<2x8x8xf32>, vector<2x8x8xf32>, vector<2x8x8xf32> -> vector<2x8x8xf32>
    "tpu.trace_stop"() : () -> ()
    %28 = vector.shape_cast %27 : vector<2x8x8xf32> to vector<16x8xf32>
    %29 = vector.extract_strided_slice %7 {offsets = [0, 0], sizes = [8, 32], strides = [1, 1]} : vector<32x32xf32> to vector<8x32xf32>
    %cst_14 = arith.constant dense<0.000000e+00> : vector<16x32xf32>
    %30 = tpu.matmul %28, %29, %cst_14 {dimension_numbers = #tpu.dot_dimension_numbers<[1], [0], [0], [1], [0, 0, 1, 1], [], []>} : vector<16x8xf32>, vector<8x32xf32>, vector<16x32xf32> -> vector<16x32xf32>
    %31 = arith.addf %8, %30 : vector<16x32xf32>
    %32 = vector.extract_strided_slice %6 {offsets = [0, 8], sizes = [16, 8], strides = [1, 1]} : vector<16x96xf32> to vector<16x8xf32>
    %33 = vector.shape_cast %32 : vector<16x8xf32> to vector<2x8x8xf32>
    %34 = vector.extract_strided_slice %6 {offsets = [0, 40], sizes = [16, 8], strides = [1, 1]} : vector<16x96xf32> to vector<16x8xf32>
    %35 = vector.shape_cast %34 : vector<16x8xf32> to vector<2x8x8xf32>
    %36 = vector.extract_strided_slice %6 {offsets = [0, 72], sizes = [16, 8], strides = [1, 1]} : vector<16x96xf32> to vector<16x8xf32>
    %37 = vector.shape_cast %36 : vector<16x8xf32> to vector<2x8x8xf32>
    "tpu.trace_start"() <{level = 10 : i32, message = "bqe,bke->bqk"}> : () -> ()
    %cst_15 = arith.constant dense<0.000000e+00> : vector<2x8x8xf32>
    %38 = tpu.matmul %33, %35, %cst_15 {dimension_numbers = #tpu.dot_dimension_numbers<[2], [2], [1], [1], [0, 0, 0, 1, 1, 1], [0], [0]>} : vector<2x8x8xf32>, vector<2x8x8xf32>, vector<2x8x8xf32> -> vector<2x8x8xf32>
    "tpu.trace_stop"() : () -> ()
    %cst_16 = arith.constant 0.353553385 : f32
    %39 = vector.broadcast %cst_16 : f32 to vector<2x8x8xf32>
    %40 = arith.mulf %38, %39 : vector<2x8x8xf32>
    %cst_17 = arith.constant dense<0xFF800000> : vector<2x8xf32>
    %41 = vector.multi_reduction <maximumf>, %40, %cst_17 [2] : vector<2x8x8xf32> to vector<2x8xf32>
    %42 = vector.shape_cast %41 : vector<2x8xf32> to vector<2x8x1xf32>
    %43 = vector.broadcast %42 : vector<2x8x1xf32> to vector<2x8x8xf32>
    %44 = arith.subf %40, %43 : vector<2x8x8xf32>
    %45 = math.exp %44 : vector<2x8x8xf32>
    %cst_18 = arith.constant dense<0.000000e+00> : vector<2x8xf32>
    %46 = vector.multi_reduction <add>, %45, %cst_18 [2] : vector<2x8x8xf32> to vector<2x8xf32>
    %47 = vector.shape_cast %46 : vector<2x8xf32> to vector<2x8x1xf32>
    %48 = vector.broadcast %47 : vector<2x8x1xf32> to vector<2x8x8xf32>
    %49 = arith.divf %45, %48 : vector<2x8x8xf32>
    "tpu.trace_start"() <{level = 10 : i32, message = "bqk,bke->bqe"}> : () -> ()
    %cst_19 = arith.constant dense<0.000000e+00> : vector<2x8x8xf32>
    %50 = tpu.matmul %49, %37, %cst_19 {dimension_numbers = #tpu.dot_dimension_numbers<[2], [1], [1], [2], [0, 0, 0, 1, 1, 2], [0], [0]>} : vector<2x8x8xf32>, vector<2x8x8xf32>, vector<2x8x8xf32> -> vector<2x8x8xf32>
    "tpu.trace_stop"() : () -> ()
    %51 = vector.shape_cast %50 : vector<2x8x8xf32> to vector<16x8xf32>
    %52 = vector.extract_strided_slice %7 {offsets = [8, 0], sizes = [8, 32], strides = [1, 1]} : vector<32x32xf32> to vector<8x32xf32>
    %cst_20 = arith.constant dense<0.000000e+00> : vector<16x32xf32>
    %53 = tpu.matmul %51, %52, %cst_20 {dimension_numbers = #tpu.dot_dimension_numbers<[1], [0], [0], [1], [0, 0, 1, 1], [], []>} : vector<16x8xf32>, vector<8x32xf32>, vector<16x32xf32> -> vector<16x32xf32>
    %54 = arith.addf %31, %53 : vector<16x32xf32>
    %55 = vector.extract_strided_slice %6 {offsets = [0, 16], sizes = [16, 8], strides = [1, 1]} : vector<16x96xf32> to vector<16x8xf32>
    %56 = vector.shape_cast %55 : vector<16x8xf32> to vector<2x8x8xf32>
    %57 = vector.extract_strided_slice %6 {offsets = [0, 48], sizes = [16, 8], strides = [1, 1]} : vector<16x96xf32> to vector<16x8xf32>
    %58 = vector.shape_cast %57 : vector<16x8xf32> to vector<2x8x8xf32>
    %59 = vector.extract_strided_slice %6 {offsets = [0, 80], sizes = [16, 8], strides = [1, 1]} : vector<16x96xf32> to vector<16x8xf32>
    %60 = vector.shape_cast %59 : vector<16x8xf32> to vector<2x8x8xf32>
    "tpu.trace_start"() <{level = 10 : i32, message = "bqe,bke->bqk"}> : () -> ()
    %cst_21 = arith.constant dense<0.000000e+00> : vector<2x8x8xf32>
    %61 = tpu.matmul %56, %58, %cst_21 {dimension_numbers = #tpu.dot_dimension_numbers<[2], [2], [1], [1], [0, 0, 0, 1, 1, 1], [0], [0]>} : vector<2x8x8xf32>, vector<2x8x8xf32>, vector<2x8x8xf32> -> vector<2x8x8xf32>
    "tpu.trace_stop"() : () -> ()
    %cst_22 = arith.constant 0.353553385 : f32
    %62 = vector.broadcast %cst_22 : f32 to vector<2x8x8xf32>
    %63 = arith.mulf %61, %62 : vector<2x8x8xf32>
    %cst_23 = arith.constant dense<0xFF800000> : vector<2x8xf32>
    %64 = vector.multi_reduction <maximumf>, %63, %cst_23 [2] : vector<2x8x8xf32> to vector<2x8xf32>
    %65 = vector.shape_cast %64 : vector<2x8xf32> to vector<2x8x1xf32>
    %66 = vector.broadcast %65 : vector<2x8x1xf32> to vector<2x8x8xf32>
    %67 = arith.subf %63, %66 : vector<2x8x8xf32>
    %68 = math.exp %67 : vector<2x8x8xf32>
    %cst_24 = arith.constant dense<0.000000e+00> : vector<2x8xf32>
    %69 = vector.multi_reduction <add>, %68, %cst_24 [2] : vector<2x8x8xf32> to vector<2x8xf32>
    %70 = vector.shape_cast %69 : vector<2x8xf32> to vector<2x8x1xf32>
    %71 = vector.broadcast %70 : vector<2x8x1xf32> to vector<2x8x8xf32>
    %72 = arith.divf %68, %71 : vector<2x8x8xf32>
    "tpu.trace_start"() <{level = 10 : i32, message = "bqk,bke->bqe"}> : () -> ()
    %cst_25 = arith.constant dense<0.000000e+00> : vector<2x8x8xf32>
    %73 = tpu.matmul %72, %60, %cst_25 {dimension_numbers = #tpu.dot_dimension_numbers<[2], [1], [1], [2], [0, 0, 0, 1, 1, 2], [0], [0]>} : vector<2x8x8xf32>, vector<2x8x8xf32>, vector<2x8x8xf32> -> vector<2x8x8xf32>
    "tpu.trace_stop"() : () -> ()
    %74 = vector.shape_cast %73 : vector<2x8x8xf32> to vector<16x8xf32>
    %75 = vector.extract_strided_slice %7 {offsets = [16, 0], sizes = [8, 32], strides = [1, 1]} : vector<32x32xf32> to vector<8x32xf32>
    %cst_26 = arith.constant dense<0.000000e+00> : vector<16x32xf32>
    %76 = tpu.matmul %74, %75, %cst_26 {dimension_numbers = #tpu.dot_dimension_numbers<[1], [0], [0], [1], [0, 0, 1, 1], [], []>} : vector<16x8xf32>, vector<8x32xf32>, vector<16x32xf32> -> vector<16x32xf32>
    %77 = arith.addf %54, %76 : vector<16x32xf32>
    %78 = vector.extract_strided_slice %6 {offsets = [0, 24], sizes = [16, 8], strides = [1, 1]} : vector<16x96xf32> to vector<16x8xf32>
    %79 = vector.shape_cast %78 : vector<16x8xf32> to vector<2x8x8xf32>
    %80 = vector.extract_strided_slice %6 {offsets = [0, 56], sizes = [16, 8], strides = [1, 1]} : vector<16x96xf32> to vector<16x8xf32>
    %81 = vector.shape_cast %80 : vector<16x8xf32> to vector<2x8x8xf32>
    %82 = vector.extract_strided_slice %6 {offsets = [0, 88], sizes = [16, 8], strides = [1, 1]} : vector<16x96xf32> to vector<16x8xf32>
    %83 = vector.shape_cast %82 : vector<16x8xf32> to vector<2x8x8xf32>
    "tpu.trace_start"() <{level = 10 : i32, message = "bqe,bke->bqk"}> : () -> ()
    %cst_27 = arith.constant dense<0.000000e+00> : vector<2x8x8xf32>
    %84 = tpu.matmul %79, %81, %cst_27 {dimension_numbers = #tpu.dot_dimension_numbers<[2], [2], [1], [1], [0, 0, 0, 1, 1, 1], [0], [0]>} : vector<2x8x8xf32>, vector<2x8x8xf32>, vector<2x8x8xf32> -> vector<2x8x8xf32>
    "tpu.trace_stop"() : () -> ()
    %cst_28 = arith.constant 0.353553385 : f32
    %85 = vector.broadcast %cst_28 : f32 to vector<2x8x8xf32>
    %86 = arith.mulf %84, %85 : vector<2x8x8xf32>
    %cst_29 = arith.constant dense<0xFF800000> : vector<2x8xf32>
    %87 = vector.multi_reduction <maximumf>, %86, %cst_29 [2] : vector<2x8x8xf32> to vector<2x8xf32>
    %88 = vector.shape_cast %87 : vector<2x8xf32> to vector<2x8x1xf32>
    %89 = vector.broadcast %88 : vector<2x8x1xf32> to vector<2x8x8xf32>
    %90 = arith.subf %86, %89 : vector<2x8x8xf32>
    %91 = math.exp %90 : vector<2x8x8xf32>
    %cst_30 = arith.constant dense<0.000000e+00> : vector<2x8xf32>
    %92 = vector.multi_reduction <add>, %91, %cst_30 [2] : vector<2x8x8xf32> to vector<2x8xf32>
    %93 = vector.shape_cast %92 : vector<2x8xf32> to vector<2x8x1xf32>
    %94 = vector.broadcast %93 : vector<2x8x1xf32> to vector<2x8x8xf32>
    %95 = arith.divf %91, %94 : vector<2x8x8xf32>
    "tpu.trace_start"() <{level = 10 : i32, message = "bqk,bke->bqe"}> : () -> ()
    %cst_31 = arith.constant dense<0.000000e+00> : vector<2x8x8xf32>
    %96 = tpu.matmul %95, %83, %cst_31 {dimension_numbers = #tpu.dot_dimension_numbers<[2], [1], [1], [2], [0, 0, 0, 1, 1, 2], [0], [0]>} : vector<2x8x8xf32>, vector<2x8x8xf32>, vector<2x8x8xf32> -> vector<2x8x8xf32>
    "tpu.trace_stop"() : () -> ()
    %97 = vector.shape_cast %96 : vector<2x8x8xf32> to vector<16x8xf32>
    %98 = vector.extract_strided_slice %7 {offsets = [24, 0], sizes = [8, 32], strides = [1, 1]} : vector<32x32xf32> to vector<8x32xf32>
    %cst_32 = arith.constant dense<0.000000e+00> : vector<16x32xf32>
    %99 = tpu.matmul %97, %98, %cst_32 {dimension_numbers = #tpu.dot_dimension_numbers<[1], [0], [0], [1], [0, 0, 1, 1], [], []>} : vector<16x8xf32>, vector<8x32xf32>, vector<16x32xf32> -> vector<16x32xf32>
    %100 = arith.addf %77, %99 : vector<16x32xf32>
    %c0_33 = arith.constant 0 : index
    %c0_34 = arith.constant 0 : index
    %101 = vector.load %arg5[%c0_33, %c0_34] : memref<1x32xf32, #tpu.memory_space<vmem>>, vector<1x32xf32>
    %102 = vector.broadcast %101 : vector<1x32xf32> to vector<16x32xf32>
    %103 = arith.addf %100, %102 : vector<16x32xf32>
    %104 = arith.addf %1, %103 : vector<16x32xf32>
    %cst_35 = arith.constant dense<0.000000e+00> : vector<16xf32>
    %105 = vector.multi_reduction <add>, %104, %cst_35 [1] : vector<16x32xf32> to vector<16xf32>
    %106 = vector.shape_cast %105 : vector<16xf32> to vector<16x1xf32>
    %cst_36 = arith.constant 3.200000e+01 : f32
    %107 = vector.broadcast %cst_36 : f32 to vector<16x1xf32>
    %108 = arith.divf %106, %107 : vector<16x1xf32>
    %109 = vector.broadcast %108 : vector<16x1xf32> to vector<16x32xf32>
    %110 = arith.subf %104, %109 : vector<16x32xf32>
    %111 = arith.mulf %110, %110 : vector<16x32xf32>
    %cst_37 = arith.constant dense<0.000000e+00> : vector<16xf32>
    %112 = vector.multi_reduction <add>, %111, %cst_37 [1] : vector<16x32xf32> to vector<16xf32>
    %113 = vector.shape_cast %112 : vector<16xf32> to vector<16x1xf32>
    %cst_38 = arith.constant 3.200000e+01 : f32
    %114 = vector.broadcast %cst_38 : f32 to vector<16x1xf32>
    %115 = arith.divf %113, %114 : vector<16x1xf32>
    %116 = vector.broadcast %108 : vector<16x1xf32> to vector<16x32xf32>
    %117 = arith.subf %104, %116 : vector<16x32xf32>
    %cst_39 = arith.constant 9.99999974E-6 : f32
    %118 = vector.broadcast %cst_39 : f32 to vector<16x1xf32>
    %119 = arith.addf %115, %118 : vector<16x1xf32>
    %120 = math.rsqrt %119 : vector<16x1xf32>
    %121 = vector.broadcast %120 : vector<16x1xf32> to vector<16x32xf32>
    %122 = arith.mulf %117, %121 : vector<16x32xf32>
    %c0_40 = arith.constant 0 : index
    %c0_41 = arith.constant 0 : index
    %123 = vector.load %arg6[%c0_40, %c0_41] : memref<1x32xf32, #tpu.memory_space<vmem>>, vector<1x32xf32>
    %124 = vector.broadcast %123 : vector<1x32xf32> to vector<16x32xf32>
    %125 = arith.mulf %122, %124 : vector<16x32xf32>
    %c0_42 = arith.constant 0 : index
    %c0_43 = arith.constant 0 : index
    %126 = vector.load %arg7[%c0_42, %c0_43] : memref<1x32xf32, #tpu.memory_space<vmem>>, vector<1x32xf32>
    %127 = vector.broadcast %126 : vector<1x32xf32> to vector<16x32xf32>
    %128 = arith.addf %125, %127 : vector<16x32xf32>
    %c0_44 = arith.constant 0 : index
    %c0_45 = arith.constant 0 : index
    %129 = vector.load %arg8[%c0_44, %c0_45] : memref<32x128xf32, #tpu.memory_space<vmem>>, vector<32x128xf32>
    %cst_46 = arith.constant dense<0.000000e+00> : vector<16x128xf32>
    %130 = tpu.matmul %128, %129, %cst_46 {dimension_numbers = #tpu.dot_dimension_numbers<[1], [0], [0], [1], [0, 0, 1, 1], [], []>} : vector<16x32xf32>, vector<32x128xf32>, vector<16x128xf32> -> vector<16x128xf32>
    %c0_47 = arith.constant 0 : index
    %c0_48 = arith.constant 0 : index
    %131 = vector.load %arg9[%c0_47, %c0_48] : memref<1x128xf32, #tpu.memory_space<vmem>>, vector<1x128xf32>
    %132 = vector.broadcast %131 : vector<1x128xf32> to vector<16x128xf32>
    %133 = arith.addf %130, %132 : vector<16x128xf32>
    %cst_49 = arith.constant 0.000000e+00 : f32
    %134 = vector.broadcast %cst_49 : f32 to vector<16x128xf32>
    %135 = arith.maximumf %133, %134 : vector<16x128xf32>
    %c0_50 = arith.constant 0 : index
    %c0_51 = arith.constant 0 : index
    %136 = vector.load %arg10[%c0_50, %c0_51] : memref<128x32xf32, #tpu.memory_space<vmem>>, vector<128x32xf32>
    %cst_52 = arith.constant dense<0.000000e+00> : vector<16x32xf32>
    %137 = tpu.matmul %135, %136, %cst_52 {dimension_numbers = #tpu.dot_dimension_numbers<[1], [0], [0], [1], [0, 0, 1, 1], [], []>} : vector<16x128xf32>, vector<128x32xf32>, vector<16x32xf32> -> vector<16x32xf32>
    %c0_53 = arith.constant 0 : index
    %c0_54 = arith.constant 0 : index
    %138 = vector.load %arg11[%c0_53, %c0_54] : memref<1x32xf32, #tpu.memory_space<vmem>>, vector<1x32xf32>
    %139 = vector.broadcast %138 : vector<1x32xf32> to vector<16x32xf32>
    %140 = arith.addf %137, %139 : vector<16x32xf32>
    %141 = arith.addf %128, %140 : vector<16x32xf32>
    %cst_55 = arith.constant dense<0.000000e+00> : vector<16xf32>
    %142 = vector.multi_reduction <add>, %141, %cst_55 [1] : vector<16x32xf32> to vector<16xf32>
    %143 = vector.shape_cast %142 : vector<16xf32> to vector<16x1xf32>
    %cst_56 = arith.constant 3.200000e+01 : f32
    %144 = vector.broadcast %cst_56 : f32 to vector<16x1xf32>
    %145 = arith.divf %143, %144 : vector<16x1xf32>
    %146 = vector.broadcast %145 : vector<16x1xf32> to vector<16x32xf32>
    %147 = arith.subf %141, %146 : vector<16x32xf32>
    %148 = arith.mulf %147, %147 : vector<16x32xf32>
    %cst_57 = arith.constant dense<0.000000e+00> : vector<16xf32>
    %149 = vector.multi_reduction <add>, %148, %cst_57 [1] : vector<16x32xf32> to vector<16xf32>
    %150 = vector.shape_cast %149 : vector<16xf32> to vector<16x1xf32>
    %cst_58 = arith.constant 3.200000e+01 : f32
    %151 = vector.broadcast %cst_58 : f32 to vector<16x1xf32>
    %152 = arith.divf %150, %151 : vector<16x1xf32>
    %153 = vector.broadcast %145 : vector<16x1xf32> to vector<16x32xf32>
    %154 = arith.subf %141, %153 : vector<16x32xf32>
    %cst_59 = arith.constant 9.99999974E-6 : f32
    %155 = vector.broadcast %cst_59 : f32 to vector<16x1xf32>
    %156 = arith.addf %152, %155 : vector<16x1xf32>
    %157 = math.rsqrt %156 : vector<16x1xf32>
    %158 = vector.broadcast %157 : vector<16x1xf32> to vector<16x32xf32>
    %159 = arith.mulf %154, %158 : vector<16x32xf32>
    %c0_60 = arith.constant 0 : index
    %c0_61 = arith.constant 0 : index
    %160 = vector.load %arg12[%c0_60, %c0_61] : memref<1x32xf32, #tpu.memory_space<vmem>>, vector<1x32xf32>
    %161 = vector.broadcast %160 : vector<1x32xf32> to vector<16x32xf32>
    %162 = arith.mulf %159, %161 : vector<16x32xf32>
    %c0_62 = arith.constant 0 : index
    %c0_63 = arith.constant 0 : index
    %163 = vector.load %arg13[%c0_62, %c0_63] : memref<1x32xf32, #tpu.memory_space<vmem>>, vector<1x32xf32>
    %164 = vector.broadcast %163 : vector<1x32xf32> to vector<16x32xf32>
    %165 = arith.addf %162, %164 : vector<16x32xf32>
    %166 = vector.shape_cast %165 : vector<16x32xf32> to vector<2x8x32xf32>
    %c0_64 = arith.constant 0 : index
    %c0_65 = arith.constant 0 : index
    %c0_66 = arith.constant 0 : index
    %167 = vector.load %arg14[%c0_64, %c0_65, %c0_66] : memref<2x8x32xf32, #tpu.memory_space<vmem>>, vector<2x8x32xf32>
    tpu.vector_store %arg14[%c0_64, %c0_65, %c0_66], %166 {strides = array<i32>} : memref<2x8x32xf32, #tpu.memory_space<vmem>>, vector<2x8x32xf32>,
    return
  }
  func.func @transform_0(%arg0: i32) -> (i32, i32, i32) {
    %c0_i32 = arith.constant 0 : i32
    %c0_i32_0 = arith.constant 0 : i32
    %c0_i32_1 = arith.constant 0 : i32
    return %arg0, %c0_i32, %c0_i32_0 : i32, i32, i32
  }
  func.func @transform_1(%arg0: i32) -> (i32, i32) {
    %c0_i32 = arith.constant 0 : i32
    %c0_i32_0 = arith.constant 0 : i32
    %c0_i32_1 = arith.constant 0 : i32
    return %c0_i32, %c0_i32_0 : i32, i32
  }
  func.func @transform_2(%arg0: i32) -> (i32, i32) {
    %c0_i32 = arith.constant 0 : i32
    %c0_i32_0 = arith.constant 0 : i32
    %c0_i32_1 = arith.constant 0 : i32
    return %c0_i32, %c0_i32_0 : i32, i32
  }
  func.func @transform_3(%arg0: i32) -> (i32, i32) {
    %c0_i32 = arith.constant 0 : i32
    %c0_i32_0 = arith.constant 0 : i32
    %c0_i32_1 = arith.constant 0 : i32
    return %c0_i32, %c0_i32_0 : i32, i32
  }
  func.func @transform_4(%arg0: i32) -> (i32, i32) {
    %c0_i32 = arith.constant 0 : i32
    %c0_i32_0 = arith.constant 0 : i32
    %c0_i32_1 = arith.constant 0 : i32
    return %c0_i32, %c0_i32_0 : i32, i32
  }
  func.func @transform_5(%arg0: i32) -> (i32, i32) {
    %c0_i32 = arith.constant 0 : i32
    %c0_i32_0 = arith.constant 0 : i32
    %c0_i32_1 = arith.constant 0 : i32
    return %c0_i32, %c0_i32_0 : i32, i32
  }
  func.func @transform_6(%arg0: i32) -> (i32, i32) {
    %c0_i32 = arith.constant 0 : i32
    %c0_i32_0 = arith.constant 0 : i32
    %c0_i32_1 = arith.constant 0 : i32
    return %c0_i32, %c0_i32_0 : i32, i32
  }
  func.func @transform_7(%arg0: i32) -> (i32, i32) {
    %c0_i32 = arith.constant 0 : i32
    %c0_i32_0 = arith.constant 0 : i32
    %c0_i32_1 = arith.constant 0 : i32
    return %c0_i32, %c0_i32_0 : i32, i32
  }
  func.func @transform_8(%arg0: i32) -> (i32, i32) {
    %c0_i32 = arith.constant 0 : i32
    %c0_i32_0 = arith.constant 0 : i32
    %c0_i32_1 = arith.constant 0 : i32
    return %c0_i32, %c0_i32_0 : i32, i32
  }
  func.func @transform_9(%arg0: i32) -> (i32, i32) {
    %c0_i32 = arith.constant 0 : i32
    %c0_i32_0 = arith.constant 0 : i32
    %c0_i32_1 = arith.constant 0 : i32
    return %c0_i32, %c0_i32_0 : i32, i32
  }
  func.func @transform_10(%arg0: i32) -> (i32, i32) {
    %c0_i32 = arith.constant 0 : i32
    %c0_i32_0 = arith.constant 0 : i32
    %c0_i32_1 = arith.constant 0 : i32
    return %c0_i32, %c0_i32_0 : i32, i32
  }
  func.func @transform_11(%arg0: i32) -> (i32, i32) {
    %c0_i32 = arith.constant 0 : i32
    %c0_i32_0 = arith.constant 0 : i32
    %c0_i32_1 = arith.constant 0 : i32
    return %c0_i32, %c0_i32_0 : i32, i32
  }
  func.func @transform_12(%arg0: i32) -> (i32, i32) {
    %c0_i32 = arith.constant 0 : i32
    %c0_i32_0 = arith.constant 0 : i32
    %c0_i32_1 = arith.constant 0 : i32
    return %c0_i32, %c0_i32_0 : i32, i32
  }
  func.func @transform_13(%arg0: i32) -> (i32, i32, i32) {
    %c0_i32 = arith.constant 0 : i32
    %c0_i32_0 = arith.constant 0 : i32
    %c0_i32_1 = arith.constant 0 : i32
    return %arg0, %c0_i32, %c0_i32_0 : i32, i32, i32
  }
}

</mosaic_0001>

<bundles_post_ra>
// kernel: tpu_custom_call.1
= control target key start
LH: loop header
LB: loop body
LE: loop exit
PB: predicated region body
PF: predicated region fallthrough
CT: control target
= control target key end

     0   :  { %s3475_s0 = inlined_call_operand.vmem [shape: f32[4,8,32], index: 0, kind: input, shape index: {}]   ;;  %s3476_s1 = inlined_call_operand.vmem [shape: f32[32,96], index: 1, kind: input, shape index: {}]   ;;  %s3477_s2 = inlined_call_operand.vmem [shape: f32[1,96], index: 2, kind: input, shape index: {}]   ;;  %s3478_s3 = inlined_call_operand.vmem [shape: f32[32,32], index: 3, kind: input, shape index: {}]   ;;  %s3479_s4 = inlined_call_operand.vmem [shape: f32[1,32], index: 4, kind: input, shape index: {}]   ;;  %s3480_s5 = inlined_call_operand.vmem [shape: f32[1,32], index: 5, kind: input, shape index: {}]   ;;  %s3481_s6 = inlined_call_operand.vmem [shape: f32[1,32], index: 6, kind: input, shape index: {}]   ;;  %s3482_s7 = inlined_call_operand.vmem [shape: f32[32,128], index: 7, kind: input, shape index: {}]   ;;  %s3483_s8 = inlined_call_operand.vmem [shape: f32[1,128], index: 8, kind: input, shape index: {}]   ;;  %s3484_s9 = inlined_call_operand.vmem [shape: f32[128,32], index: 9, kind: input, shape index: {}]   ;;  %s3485_s10 = inlined_call_operand.vmem [shape: f32[1,32], index: 10, kind: input, shape index: {}]   ;;  %s3486_s11 = inlined_call_operand.vmem [shape: f32[1,32], index: 11, kind: input, shape index: {}]   ;;  %s3487_s12 = inlined_call_operand.vmem [shape: f32[1,32], index: 12, kind: input, shape index: {}]   ;;  %s3488_s13 = inlined_call_operand.hbm [shape: f32[4,8,32], index: 13, kind: output, shape index: {}]  }
   0x1   :  { %3489 = sst [smem:[#allocation6_spill]] %s3475_s0 }
   0x2   :  { %3490 = sst [smem:[#allocation7_spill]] %s3476_s1 }
   0x3   :  { %3491 = sst [smem:[#allocation8_spill]] %s3477_s2 }
   0x4   :  { %18 = vsyncpa [#allocation3], 0 }
   0x5   :  { %20 = vsyncpa [#allocation3 + $0x1], 0  ;;  %s3098_s25 = smov 0   ;;  %s3100_s26 = smov 0  }
   0x6   :  { %s3102_s27 = smov 0   ;;  %s3104_s28 = smov 0  }
   0x7 LB: > { %s3119_s29 = sadd.s32 4294967295, %s3010_s28   ;;  %s2568_s30 = sadd.s32 4294967294, %s3010_s28   ;;  %s3010_s28 = sphi %s3104_s28, %s3502_s28   ;;  %s3006_s27 = sphi %s3102_s27, %s3501_s27   ;;  %s3002_s26 = sphi %s3100_s26, %s3500_s26   ;;  %s2998_s25 = sphi %s3098_s25, %s3499_s25  }
   0x8   : > { %s3123_s14 = sadd.s32 1, %s3010_s28   ;;  %s311_s15 = sadd.s32 1, %s3006_s27 }
   0x9   : > { %s308_s16 = ssub.s32 %s3010_s28, %s3123_s14  ;;  %p321_p0 = scmp.ne.s32.totalorder %s3006_s27, %s3002_s26 }
   0xa   : > { %p309_p1 = scmp.eq.s32.totalorder %s308_s16, 0  ;;  %p322_p2 = scmp.eq.s32.totalorder %s3119_s29, 1 }
   0xb   : > { %p327_p3 = scmp.ne.s32.totalorder %s3002_s26, %s2998_s25  ;;  %p328_p4 = scmp.eq.s32.totalorder %s2568_s30, 1 }
   0xc   : > { %s3134_s17 = scalar_select %p309_p1, %s3006_s27, %s311_s15  }
   0xd   : > { %p3136_p5 = por %p322_p2, %p321_p0  ;;  %p3140_p6 = por %p328_p4, %p327_p3 }
   0xe   : > { %3492 = sst [smem:[#allocation5_spill]] %s3134_s17  ;;  %p2571_p7 = scmp.ge.s32.totalorder %s3010_s28, 1 }
   0xf   : > { %p391_p8 = scmp.lt.s32.totalorder %s3010_s28, 3 }
  0x11   : > { %p392_p9 = pnand %p2571_p7, %p391_p8 }
  0x12   : > { %s3495_s1 = sld [smem:[#allocation7_spill]] (!%p392_p9)  ;;  %s2573_s24 = sshll.u32 (!%p392_p9), %s3119_s29, 1 }
  0x13   : > { %395 = sbr.rel (%p392_p9) target bundleno = 4204 (0x106c), region = 72  ;;  %p436_p10 = scmp.lt.s32.totalorder (!%p392_p9), %s2573_s24, 3 }
  0x14   : > { %s3496_s0 = sld [smem:[#allocation6_spill]] (!%p392_p9)  ;;  %s3014_s30 = smov (!%p392_p9), 96  }
  0x15   : > { %s3497_s2 = sld [smem:[#allocation8_spill]] (!%p392_p9)  ;;  %s3015_s15 = smov (!%p392_p9), 64  }
  0x16   : > { %s3016_s16 = smov (!%p392_p9), 88   ;;  %s3018_s21 = smov (!%p392_p9), 56  }
  0x17   : > { %s3019_s22 = smov (!%p392_p9), 112   ;;  %s3024_s17 = smov (!%p392_p9), 40  }
  0x18   : > { %v447_v0 = vld [vmem:[%s3495_s1 + $0x18] sm:$0xff]  ;;  %v446_v1 = vld [vmem:[%s3495_s1 + $0x10] sm:$0xff]  ;;  %v445_v2 = vld [vmem:[%s3495_s1 + $0x8] sm:$0xff]  ;;  %s3504_s24 = smov (!%p436_p10, %s2573_s24), 3  ;;  %vm455_vm0 = vcmask 261120   ;;  %v3012_v6 = vmov 0.0  }
  0x19   : > { %2699 = vmatprep.subr.mxu0 %v447_v0  ;;  %v444_v3 = vld [vmem:[%s3495_s1] sm:$0xff]  ;;  %s2574_s20 = sshll.u32 %s3504_s24, 3  ;;  %2735 = vmatprep.subr.mxu1 %v3012_v6  ;;  %vm3013_vm1 = vmmov 0   ;;  %vm544_vm2 = vcmask 64512   ;;  %s3020_s24 = smov 80  }
  0x1a   : > { %2700 = vmatpush3.msra.mxu0 %v447_v0  ;;  %s439_s23 = scalar_lea.vmem %s3496_s0, %s2574_s20  ;;  %2737 = vmatprep.mubr.msk.f32.mxu1 %vm3013_vm1, %v3012_v6  ;;  %s3017_s20 = smov 120  }
  0x1b   : > { %2701 = vmatprep.subr.mxu0 %v446_v1  ;;  %v3162_v4 = vld [vmem:[%s439_s23] sm:$0xff]  ;;  %v3164_v5 = vld [vmem:[%s439_s23 + $0x8] sm:$0xff]  ;;  %s432_s23 = sand.u32 1, %s3002_s26   ;;  %s3025_s0 = smov [#allocation2]  }
  0x1c   : > { %2702 = vmatpush3.msra.mxu0 %v446_v1  ;;  %2707 = vmatprep.mubr.msk.f32.mxu0 %vm455_vm0, %v3162_v4  ;;  %v2575_v8 = vld [vmem:[%s3497_s2] ss:$0 sm:$0xff]  ;;  %s2954_s1 = sshll.u32 %s3025_s0, 4  ;;  %s2955_s1 = int_to_ptr.vmem [resolvable:$false] %s2954_s1 }
  0x1d   : > { %2703 = vmatprep.subr.mxu0 %v445_v2 }
  0x1e   : > { %2704 = vmatpush3.msra.mxu0 %v445_v2 }
  0x1f   : > { %2705 = vmatprep.subr.mxu0 %v444_v3 }
  0x20   : > { %2706 = vmatpush3.msra.mxu0 %v444_v3  ;;  %v537_v3 = vld [vmem:[%s3478_s3] sm:$0xff] }
  0x21   : > { %2708 = vmatmul.mubr.msk.f32.vlgmr.msra.gmra.mxu0 %vm455_vm0, %v3164_v5  ;;  %2710 = vmatprep.subr.mxu0 %v3012_v6 }
  0x22   : > { %2712 = vmatprep.mubr.msk.f32.mxu0 %vm3013_vm1, %v3012_v6 }
  0xe1   : > { %v2709_v7 = vpop.f32.mrf.mxu0 }
  0xe2   : > { %v3182_v11 = vadd.f32 %v2709_v7, %v2575_v8 }
  0xe3   : > { %v528_v9 = vpop.f32.mrf.mxu0 }
  0xe4   : > { %v3179_v10 = vadd.f32 %v2575_v8, %v528_v9 }
  0xe6   : > { %542 = vrot.lane.b32.xlu0 %v3179_v10, %s3014_s30 }
  0xea   : > { %620 = vrot.lane.b32.xlu0 %v3182_v11, %s3014_s30 }
 0x158   : > { %v543_v12 = vpop.permute.xlu0 %542 }
 0x159   : > { %2711 = vmatpush3.xpose.msk.msra.mxu0 %vm544_vm2, %v543_v12 }
 0x15a   : > { %2715 = vmatprep.subr.mxu0 %v3012_v6 }
 0x15c   : > { %2713 = vmatmul.mubr.msk.f32.vlgmr.msra.gmra.mxu0 %vm544_vm2, %v3179_v10  ;;  %v621_v13 = vpop.permute.xlu0 %620 }
 0x15d   : > { %2716 = vmatpush3.xpose.msk.msra.mxu0 %vm544_vm2, %v621_v13  ;;  %2717 = vmatprep.mubr.msk.f32.mxu0 %vm3013_vm1, %v3012_v6 }
 0x15e   : > { %2720 = vmatprep.subr.mxu0 %v3012_v6 }
 0x160   : > { %2718 = vmatmul.mubr.msk.f32.vlgmr.msra.gmra.mxu0 %vm544_vm2, %v3182_v11 }
 0x161   : > { %2722 = vmatprep.mubr.msk.f32.mxu0 %vm3013_vm1, %v3012_v6 }
 0x21c   : > { %v615_v14 = vpop.f32.mrf.mxu0 }
 0x21d   : > { %v696_v15 = vmul.f32 0.35355338, %v615_v14 }
 0x21e   : > { %v2714_v16 = vpop.f32.mrf.mxu0 }
 0x21f   : > { %v698_v17 = vsel %vm544_vm2, %v696_v15, -inf }
 0x220   : > { %699 = vmax.xlane.f32.xlu1 %v698_v17  ;;  %v692_v18 = vpop.f32.mrf.mxu0 }
 0x221   : > { %v697_v19 = vmul.f32 0.35355338, %v692_v18 }
 0x222   : > { %v2719_v20 = vpop.f32.mrf.mxu0 }
 0x223   : > { %v701_v21 = vsel %vm544_vm2, %v697_v19, -inf }
 0x224   : > { %702 = vmax.xlane.f32.xlu1 %v701_v21 }
 0x235   : > { %720 = vrot.lane.b32.xlu1 %v3179_v10, %s3015_s15 }
 0x239   : > { %796 = vrot.lane.b32.xlu1 %v3182_v11, %s3015_s15 }
 0x23d   : > { %874 = vrot.lane.b32.xlu1 %v3179_v10, %s3016_s16 }
 0x241   : > { %952 = vrot.lane.b32.xlu1 %v3182_v11, %s3016_s16  ;;  %s3021_s16 = smov 48  }
 0x2a9   : > { %v700_v22 = vpop.xlane.xlu1 %699 }
 0x2aa   : > { %v704_v23 = vsub.f32 %v696_v15, %v700_v22 }
 0x2ac   : > { %v706_v24 = vmul.f32 1.442695, %v704_v23 }
 0x2ad   : > { %v703_v25 = vpop.xlane.xlu1 %702 }
 0x2ae   : > { %2910 = vpow2.f32 %v706_v24  ;;  %v705_v26 = vsub.f32 %v697_v19, %v703_v25  ;;  %v538_v19 = vld [vmem:[%s3478_s3 + $0x8] sm:$0xff] }
 0x2b0   : > { %v708_v27 = vmul.f32 1.442695, %v705_v26 }
 0x2b1   : > { %v721_v28 = vpop.permute.xlu1 %720 }
 0x2b2   : > { %2912 = vpow2.f32 %v708_v27  ;;  %2721 = vmatpush3.msra.mxu0 %v721_v28 }
 0x2b3   : > { %2725 = vmatprep.subr.mxu0 %v3012_v6 }
 0x2b5   : > { %v797_v29 = vpop.permute.xlu1 %796 }
 0x2b9   : > { %v875_v30 = vpop.permute.xlu1 %874 }
 0x2bb   : > { %v2911_v31 = vpop.eup %2910 }
 0x2bc   : > { %v710_v32 = vsel %vm544_vm2, %v2911_v31, 0.0 }
 0x2bd   : > { %711 = vadd.xlane.f32.xlu0 %v710_v32  ;;  %v953_v33 = vpop.permute.xlu1 %952 }
 0x2be   : > { %2736 = vmatpush3.xpose.msk.msra.mxu1 %vm544_vm2, %v953_v33 }
 0x2bf   : > { %v2913_v34 = vpop.eup %2912  ;;  %2745 = vmatprep.subr.mxu1 %v3012_v6 }
 0x2c0   : > { %v713_v35 = vsel %vm544_vm2, %v2913_v34, 0.0 }
 0x2c1   : > { %714 = vadd.xlane.f32.xlu1 %v713_v35 }
 0x2d2   : > { %950 = vrot.lane.b32.xlu1 %v3182_v11, %s3017_s20 }
 0x2d3   : > { %872 = vrot.lane.b32.xlu0 %v3179_v10, %s3017_s20  ;;  %s3022_s20 = smov 72  }
 0x346   : > { %v712_v36 = vpop.xlane.xlu0 %711 }
 0x347   : > { %2914 = vrcp.f32 %v712_v36 }
 0x34a   : > { %v715_v37 = vpop.xlane.xlu1 %714  ;;  %v873_v43 = vpop.permute.xlu0 %872 }
 0x34b   : > { %2916 = vrcp.f32 %v715_v37 }
 0x34e   : > { %v951_v38 = vpop.permute.xlu1 %950 }
 0x34f   : > { %2738 = vmatmul.mubr.msk.f32.vlgmr.msra.gmra.mxu1 %vm544_vm2, %v951_v38 }
 0x350   : > { %2747 = vmatprep.mubr.msk.f32.mxu1 %vm3013_vm1, %v3012_v6 }
 0x354   : > { %v2915_v39 = vpop.eup %2914 }
 0x355   : > { %v717_v40 = vmul.f32 %v2915_v39, %v2911_v31 }
 0x357   : > { %2723 = vmatmul.mubr.msk.f32.vlgmr.msra.gmra.mxu0 %vm544_vm2, %v717_v40 }
 0x358   : > { %v2917_v41 = vpop.eup %2916  ;;  %2726 = vmatpush3.msra.mxu0 %v797_v29  ;;  %2727 = vmatprep.mubr.msk.f32.mxu0 %vm3013_vm1, %v3012_v6 }
 0x359   : > { %2730 = vmatprep.subr.mxu0 %v3012_v6  ;;  %v719_v42 = vmul.f32 %v2917_v41, %v2913_v34 }
 0x35b   : > { %2728 = vmatmul.mubr.msk.f32.vlgmr.msra.gmra.mxu0 %vm544_vm2, %v719_v42 }
 0x35c   : > { %2731 = vmatpush3.xpose.msk.msra.mxu0 %vm544_vm2, %v875_v30  ;;  %2732 = vmatprep.mubr.msk.f32.mxu0 %vm3013_vm1, %v3012_v6 }
 0x35d   : > { %2740 = vmatprep.subr.mxu0 %v3012_v6 }
 0x35f   : > { %2733 = vmatmul.mubr.msk.f32.vlgmr.msra.gmra.mxu0 %vm544_vm2, %v873_v43 }
 0x360   : > { %2742 = vmatprep.mubr.msk.f32.mxu0 %vm3013_vm1, %v3012_v6 }
 0x40f   : > { %v1024_v44 = vpop.f32.mrf.mxu1 }
 0x410   : > { %v1029_v45 = vmul.f32 0.35355338, %v1024_v44 }
 0x411   : > { %v2739_v46 = vpop.f32.mrf.mxu1 }
 0x412   : > { %v1033_v47 = vsel %vm544_vm2, %v1029_v45, -inf }
 0x413   : > { %1034 = vmax.xlane.f32.xlu0 %v1033_v47 }
 0x417   : > { %v792_v48 = vpop.f32.mrf.mxu0 }
 0x419   : > { %v2724_v49 = vpop.f32.mrf.mxu0 }
 0x41b   : > { %v868_v50 = vpop.f32.mrf.mxu0 }
 0x41d   : > { %v2729_v51 = vpop.f32.mrf.mxu0 }
 0x41f   : > { %v946_v52 = vpop.f32.mrf.mxu0 }
 0x420   : > { %v1028_v53 = vmul.f32 0.35355338, %v946_v52 }
 0x421   : > { %v2734_v54 = vpop.f32.mrf.mxu0 }
 0x422   : > { %v1030_v55 = vsel %vm544_vm2, %v1028_v53, -inf }
 0x423   : > { %1031 = vmax.xlane.f32.xlu1 %v1030_v55 }
 0x429   : > { %1128 = vrot.lane.b32.xlu0 %v3182_v11, %s3018_s21 }
 0x42d   : > { %1366 = vrot.lane.b32.xlu0 %v3179_v10, %s3019_s22 }
 0x49c   : > { %v1035_v56 = vpop.xlane.xlu0 %1034 }
 0x49d   : > { %v1037_v57 = vsub.f32 %v1029_v45, %v1035_v56 }
 0x49f   : > { %v1040_v58 = vmul.f32 1.442695, %v1037_v57  ;;  %v539_v57 = vld [vmem:[%s3478_s3 + $0x10] sm:$0xff] }
 0x4a0   : > { %v1129_v59 = vpop.permute.xlu0 %1128 }
 0x4a1   : > { %2918 = vpow2.f32 %v1040_v58  ;;  %2746 = vmatpush3.msra.mxu1 %v1129_v59 }
 0x4a2   : > { %2755 = vmatprep.subr.mxu1 %v537_v3 }
 0x4a4   : > { %v1367_v30 = vpop.permute.xlu0 %1366 }
 0x4ac   : > { %v1032_v60 = vpop.xlane.xlu1 %1031 }
 0x4ad   : > { %v1036_v61 = vsub.f32 %v1028_v53, %v1032_v60 }
 0x4ae   : > { %v2919_v62 = vpop.eup %2918 }
 0x4af   : > { %v1038_v63 = vmul.f32 1.442695, %v1036_v61  ;;  %v1045_v0 = vsel %vm544_vm2, %v2919_v62, 0.0 }
 0x4b0   : > { %1046 = vadd.xlane.f32.xlu1 %v1045_v0 }
 0x4b1   : > { %2920 = vpow2.f32 %v1038_v63 }
 0x4be   : > { %v2921_v1 = vpop.eup %2920 }
 0x4bf   : > { %v1042_v2 = vsel %vm544_vm2, %v2921_v1, 0.0 }
 0x4c0   : > { %1043 = vadd.xlane.f32.xlu1 %v1042_v2 }
 0x4d1   : > { %1052 = vrot.lane.b32.xlu1 %v3179_v10, %s3018_s21  ;;  %s3023_s21 = smov 104  }
 0x4d5   : > { %1368 = vrot.lane.b32.xlu1 %v3179_v10, %s3020_s24 }
 0x4d9   : > { %1446 = vrot.lane.b32.xlu1 %v3182_v11, %s3020_s24  ;;  %s2956_s24 = scalar_lea.vmem %s2955_s1, 512 }
 0x4dd   : > { %1444 = vrot.lane.b32.xlu1 %v3182_v11, %s3019_s22 }
 0x539   : > { %v1047_v7 = vpop.xlane.xlu1 %1046 }
 0x53a   : > { %2922 = vrcp.f32 %v1047_v7 }
 0x547   : > { %v2923_v8 = vpop.eup %2922 }
 0x548   : > { %v1051_v9 = vmul.f32 %v2923_v8, %v2919_v62 }
 0x549   : > { %v1044_v12 = vpop.xlane.xlu1 %1043 }
 0x54a   : > { %2924 = vrcp.f32 %v1044_v12  ;;  %2748 = vmatmul.mubr.msk.f32.vlgmr.msra.gmra.mxu1 %vm544_vm2, %v1051_v9 }
 0x54b   : > { %2757 = vmatprep.mubr.msk.f32.mxu1 %vm544_vm2, %v792_v48  ;;  %2756 = vmatpush3.msra.mxu1 %v537_v3 }
 0x54c   : > { %2765 = vmatprep.subr.mxu1 %v3012_v6 }
 0x54d   : > { %v1053_v13 = vpop.permute.xlu1 %1052 }
 0x54e   : > { %2741 = vmatpush3.msra.mxu0 %v1053_v13  ;;  %2758 = vmatmul.mubr.msk.f32.vlgmr.msra.gmra.mxu1 %vm544_vm2, %v868_v50 }
 0x54f   : > { %2767 = vmatprep.mubr.msk.f32.mxu1 %vm3013_vm1, %v3012_v6  ;;  %2750 = vmatprep.subr.mxu0 %v538_v19 }
 0x551   : > { %v1369_v14 = vpop.permute.xlu1 %1368 }
 0x555   : > { %v1447_v15 = vpop.permute.xlu1 %1446 }
 0x556   : > { %2766 = vmatpush3.xpose.msk.msra.mxu1 %vm544_vm2, %v1447_v15 }
 0x557   : > { %v2925_v16 = vpop.eup %2924  ;;  %2775 = vmatprep.subr.mxu1 %v3012_v6 }
 0x558   : > { %v1049_v17 = vmul.f32 %v2925_v16, %v2921_v1 }
 0x559   : > { %v1445_v18 = vpop.permute.xlu1 %1444 }
 0x55a   : > { %2743 = vmatmul.mubr.msk.f32.vlgmr.msra.gmra.mxu0 %vm544_vm2, %v1049_v17  ;;  %2768 = vmatmul.mubr.msk.f32.vlgmr.msra.gmra.mxu1 %vm544_vm2, %v1445_v18 }
 0x55b   : > { %2777 = vmatprep.mubr.msk.f32.mxu1 %vm3013_vm1, %v3012_v6  ;;  %2751 = vmatpush3.msra.mxu0 %v538_v19 }
 0x55c   : > { %2760 = vmatprep.subr.mxu0 %v3012_v6 }
 0x60a   : > { %v1200_v20 = vpop.f32.mrf.mxu1 }
 0x60c   : > { %v2749_v21 = vpop.f32.mrf.mxu1 }
 0x60e   : > { %v3254_v22 = vpop.f32.mrf.mxu1 }
 0x610   : > { %v3256_v23 = vpop.f32.mrf.mxu1 }
 0x61a   : > { %v1124_v24 = vpop.f32.mrf.mxu0  ;;  %v1518_v25 = vpop.f32.mrf.mxu1 }
 0x61b   : > { %v1523_v26 = vmul.f32 0.35355338, %v1518_v25  ;;  %2752 = vmatprep.mubr.msk.f32.mxu0 %vm544_vm2, %v1124_v24 }
 0x61c   : > { %v2744_v27 = vpop.f32.mrf.mxu0  ;;  %2753 = vmatmul.mubr.msk.f32.vlgmr.msra.gmra.mxu0 %vm544_vm2, %v1200_v20  ;;  %v2769_v28 = vpop.f32.mrf.mxu1 }
 0x61d   : > { %2761 = vmatpush3.xpose.msk.msra.mxu0 %vm544_vm2, %v1369_v14  ;;  %v1527_v29 = vsel %vm544_vm2, %v1523_v26, -inf  ;;  %2762 = vmatprep.mubr.msk.f32.mxu0 %vm3013_vm1, %v3012_v6 }
 0x61e   : > { %1528 = vmax.xlane.f32.xlu1 %v1527_v29  ;;  %2770 = vmatprep.subr.mxu0 %v3012_v6 }
 0x620   : > { %2763 = vmatmul.mubr.msk.f32.vlgmr.msra.gmra.mxu0 %vm544_vm2, %v1367_v30 }
 0x621   : > { %2772 = vmatprep.mubr.msk.f32.mxu0 %vm3013_vm1, %v3012_v6 }
 0x62f   : > { %1546 = vrot.lane.b32.xlu1 %v3179_v10, %s3021_s16 }
 0x633   : > { %1783 = vrot.lane.b32.xlu1 %v3179_v10, %s3022_s20 }
 0x637   : > { %1861 = vrot.lane.b32.xlu1 %v3182_v11, %s3022_s20  ;;  %s2624_s20 = sshll.u32 %s3119_s29, 8  ;;  %s3435_s29 = scalar_lea.sflag [#allocation3], %s432_s23 }
 0x638   : > { %s3429_s2 = scalar_lea.hbm %s3488_s13, %s2624_s20 }
 0x63b   : > { %1859 = vrot.lane.b32.xlu1 %v3182_v11, %s3023_s21 }
 0x6a7   : > { %v1529_v31 = vpop.xlane.xlu1 %1528 }
 0x6a8   : > { %v1531_v33 = vsub.f32 %v1523_v26, %v1529_v31 }
 0x6aa   : > { %v1534_v34 = vmul.f32 1.442695, %v1531_v33 }
 0x6ab   : > { %v1547_v32 = vpop.permute.xlu1 %1546 }
 0x6ac   : > { %2771 = vmatpush3.msra.mxu0 %v1547_v32  ;;  %2926 = vpow2.f32 %v1534_v34 }
 0x6ad   : > { %2780 = vmatprep.subr.mxu0 %v539_v57 }
 0x6af   : > { %v1784_v53 = vpop.permute.xlu1 %1783 }
 0x6b3   : > { %v1862_v0 = vpop.permute.xlu1 %1861 }
 0x6b7   : > { %v1860_v3 = vpop.permute.xlu1 %1859 }
 0x6b9   : > { %v2927_v41 = vpop.eup %2926 }
 0x6ba   : > { %v1539_v42 = vsel %vm544_vm2, %v2927_v41, 0.0 }
 0x6dc   : > { %v3272_v35 = vpop.f32.mrf.mxu0 }
 0x6dd   : > { %v1363_v14 = vadd.f32 %v3254_v22, %v3272_v35 }
 0x6de   : > { %v3274_v36 = vpop.f32.mrf.mxu0 }
 0x6df   : > { %v1358_v16 = vadd.f32 %v3256_v23, %v3274_v36 }
 0x6e0   : > { %v1440_v37 = vpop.f32.mrf.mxu0 }
 0x6e1   : > { %v1522_v38 = vmul.f32 0.35355338, %v1440_v37 }
 0x6e2   : > { %v2764_v39 = vpop.f32.mrf.mxu0 }
 0x6e3   : > { %v1524_v40 = vsel %vm544_vm2, %v1522_v38, -inf }
 0x6e4   : > { %1525 = vmax.xlane.f32.xlu0 %v1524_v40  ;;  %v2610_v40 = vld [vmem:[%s3479_s4] ss:$0 sm:$0xff] }
 0x6e8   : > { %1540 = vadd.xlane.f32.xlu0 %v1539_v42 }
 0x76d   : > { %v1526_v43 = vpop.xlane.xlu0 %1525 }
 0x76e   : > { %v1530_v44 = vsub.f32 %v1522_v38, %v1526_v43 }
 0x770   : > { %v1532_v45 = vmul.f32 1.442695, %v1530_v44 }
 0x771   : > { %v1541_v48 = vpop.xlane.xlu0 %1540 }
 0x772   : > { %2928 = vpow2.f32 %v1532_v45 }
 0x773   : > { %2930 = vrcp.f32 %v1541_v48 }
 0x77f   : > { %v2929_v46 = vpop.eup %2928 }
 0x780   : > { %v1536_v47 = vsel %vm544_vm2, %v2929_v46, 0.0  ;;  %v2931_v50 = vpop.eup %2930 }
 0x781   : > { %1537 = vadd.xlane.f32.xlu0 %v1536_v47  ;;  %v1545_v52 = vmul.f32 %v2931_v50, %v2927_v41 }
 0x797   : > { %1622 = vrot.lane.b32.xlu0 %v3182_v11, %s3021_s16 }
 0x79b   : > { %1781 = vrot.lane.b32.xlu0 %v3179_v10, %s3023_s21 }
 0x80a   : > { %v1538_v49 = vpop.xlane.xlu0 %1537 }
 0x80b   : > { %2932 = vrcp.f32 %v1538_v49 }
 0x80e   : > { %v1623_v51 = vpop.permute.xlu0 %1622 }
 0x80f   : > { %2776 = vmatpush3.msra.mxu1 %v1623_v51 }
 0x810   : > { %2778 = vmatmul.mubr.msk.f32.vlgmr.msra.gmra.mxu1 %vm544_vm2, %v1545_v52  ;;  %2785 = vmatprep.subr.mxu1 %v3012_v6 }
 0x811   : > { %2786 = vmatpush3.xpose.msk.msra.mxu1 %vm544_vm2, %v1784_v53  ;;  %2787 = vmatprep.mubr.msk.f32.mxu1 %vm3013_vm1, %v3012_v6 }
 0x812   : > { %v1782_v54 = vpop.permute.xlu0 %1781  ;;  %2795 = vmatprep.subr.mxu1 %v3012_v6 }
 0x814   : > { %2788 = vmatmul.mubr.msk.f32.vlgmr.msra.gmra.mxu1 %vm544_vm2, %v1782_v54 }
 0x815   : > { %2797 = vmatprep.mubr.msk.f32.mxu1 %vm3013_vm1, %v3012_v6 }
 0x818   : > { %v2933_v55 = vpop.eup %2932 }
 0x819   : > { %v1543_v56 = vmul.f32 %v2933_v55, %v2929_v46 }
 0x81b   : > { %2773 = vmatmul.mubr.msk.f32.vlgmr.msra.gmra.mxu0 %vm544_vm2, %v1543_v56 }
 0x81c   : > { %2781 = vmatpush3.msra.mxu0 %v539_v57 }
 0x81d   : > { %2790 = vmatprep.subr.mxu0 %v3012_v6 }
 0x8d0   : > { %v1694_v58 = vpop.f32.mrf.mxu1 }
 0x8d2   : > { %v2779_v59 = vpop.f32.mrf.mxu1 }
 0x8d3   : > { %v2254_v59 = vld [vmem:[%s3482_s7 + $0x10] sm:$0xff] }
 0x8d4   : > { %v1855_v60 = vpop.f32.mrf.mxu1 }
 0x8d5   : > { %v1937_v61 = vmul.f32 0.35355338, %v1855_v60  ;;  %v2253_v60 = vld [vmem:[%s3482_s7 + $0x8] sm:$0xff] }
 0x8d6   : > { %v2789_v62 = vpop.f32.mrf.mxu1 }
 0x8d7   : > { %v1939_v63 = vsel %vm544_vm2, %v1937_v61, -inf  ;;  %v2361_v62 = vld [vmem:[%s3484_s9 + $0x78] sm:$0xff] }
 0x8d8   : > { %1940 = vmax.xlane.f32.xlu0 %v1939_v63  ;;  %v2360_v63 = vld [vmem:[%s3484_s9 + $0x70] sm:$0xff] }
 0x8db   : > { %v1618_v1 = vpop.f32.mrf.mxu0 }
 0x8dc   : > { %2782 = vmatprep.mubr.msk.f32.mxu0 %vm544_vm2, %v1618_v1  ;;  %v2358_v1 = vld [vmem:[%s3484_s9 + $0x60] sm:$0xff] }
 0x8dd   : > { %v2774_v2 = vpop.f32.mrf.mxu0  ;;  %2783 = vmatmul.mubr.msk.f32.vlgmr.msra.gmra.mxu0 %vm544_vm2, %v1694_v58  ;;  %v2255_v58 = vld [vmem:[%s3482_s7 + $0x18] sm:$0xff] }
 0x8de   : > { %2791 = vmatpush3.xpose.msk.msra.mxu0 %vm544_vm2, %v1862_v0  ;;  %2792 = vmatprep.mubr.msk.f32.mxu0 %vm3013_vm1, %v3012_v6  ;;  %v2359_v0 = vld [vmem:[%s3484_s9 + $0x68] sm:$0xff]  ;;  %v2357_v2 = vld [vmem:[%s3484_s9 + $0x58] sm:$0xff] }
 0x8df   : > { %2800 = vmatprep.subr.mxu0 %v3012_v6 }
 0x8e1   : > { %2793 = vmatmul.mubr.msk.f32.vlgmr.msra.gmra.mxu0 %vm544_vm2, %v1860_v3  ;;  %v2356_v3 = vld [vmem:[%s3484_s9 + $0x50] sm:$0xff] }
 0x8e2   : > { %2802 = vmatprep.mubr.msk.f32.mxu0 %vm3013_vm1, %v3012_v6 }
 0x961   : > { %v1941_v7 = vpop.xlane.xlu0 %1940 }
 0x962   : > { %v1945_v8 = vsub.f32 %v1937_v61, %v1941_v7  ;;  %v2252_v61 = vld [vmem:[%s3482_s7] sm:$0xff]  ;;  %v2355_v7 = vld [vmem:[%s3484_s9 + $0x48] sm:$0xff] }
 0x964   : > { %v1947_v9 = vmul.f32 1.442695, %v1945_v8  ;;  %v2354_v8 = vld [vmem:[%s3484_s9 + $0x40] sm:$0xff] }
 0x966   : > { %2934 = vpow2.f32 %v1947_v9  ;;  %v2353_v9 = vld [vmem:[%s3484_s9 + $0x38] sm:$0xff] }
 0x973   : > { %v2935_v12 = vpop.eup %2934 }
 0x974   : > { %v1951_v13 = vsel %vm544_vm2, %v2935_v12, 0.0 }
 0x975   : > { %1952 = vadd.xlane.f32.xlu0 %v1951_v13  ;;  %v2351_v13 = vld [vmem:[%s3484_s9 + $0x28] sm:$0xff] }
 0x99d   : > { %v2784_v15 = vpop.f32.mrf.mxu0 }
 0x99e   : > { %v1780_v17 = vadd.f32 %v2784_v15, %v1363_v14  ;;  %v2350_v14 = vld [vmem:[%s3484_s9 + $0x20] sm:$0xff] }
 0x99f   : > { %v1770_v18 = vpop.f32.mrf.mxu0 }
 0x9a0   : > { %v1779_v19 = vadd.f32 %v1770_v18, %v1358_v16 }
 0x9a1   : > { %v1933_v20 = vpop.f32.mrf.mxu0 }
 0x9a2   : > { %v1938_v6 = vmul.f32 0.35355338, %v1933_v20 }
 0x9a3   : > { %v2794_v21 = vpop.f32.mrf.mxu0 }
 0x9a4   : > { %v1942_v24 = vsel %vm544_vm2, %v1938_v6, -inf }
 0x9a5   : > { %1943 = vmax.xlane.f32.xlu1 %v1942_v24  ;;  %v2611_v24 = vld [vmem:[%s3480_s5] ss:$0 sm:$0xff] }
 0x9b6   : > { %1961 = vrot.lane.b32.xlu1 %v3179_v10, %s3024_s17  ;;  %v540_v10 = vld [vmem:[%s3478_s3 + $0x18] sm:$0xff] }
 0x9fe   : > { %v1953_v25 = vpop.xlane.xlu0 %1952 }
 0x9ff   : > { %2936 = vrcp.f32 %v1953_v25 }
 0xa0c   : > { %v2937_v22 = vpop.eup %2936 }
 0xa0d   : > { %v1958_v23 = vmul.f32 %v2937_v22, %v2935_v12  ;;  %v2352_v12 = vld [vmem:[%s3484_s9 + $0x30] sm:$0xff] }
 0xa2e   : > { %v1944_v26 = vpop.xlane.xlu1 %1943 }
 0xa2f   : > { %v1946_v27 = vsub.f32 %v1938_v6, %v1944_v26 }
 0xa31   : > { %v1949_v28 = vmul.f32 1.442695, %v1946_v27 }
 0xa32   : > { %v1962_v29 = vpop.permute.xlu1 %1961 }
 0xa33   : > { %2938 = vpow2.f32 %v1949_v28  ;;  %2796 = vmatpush3.msra.mxu1 %v1962_v29  ;;  %v2612_v28 = vld [vmem:[%s3481_s6] ss:$0 sm:$0xff] }
 0xa34   : > { %2798 = vmatmul.mubr.msk.f32.vlgmr.msra.gmra.mxu1 %vm544_vm2, %v1958_v23  ;;  %2805 = vmatprep.subr.mxu1 %v540_v10 }
 0xa35   : > { %2806 = vmatpush3.msra.mxu1 %v540_v10  ;;  %v2347_v10 = vld [vmem:[%s3484_s9 + $0x8] sm:$0xff] }
 0xa36   : > { %2821 = vmatprep.subr.mxu1 %v2361_v62 }
 0xa40   : > { %v2939_v30 = vpop.eup %2938 }
 0xa41   : > { %v1954_v31 = vsel %vm544_vm2, %v2939_v30, 0.0 }
 0xa42   : > { %1955 = vadd.xlane.f32.xlu0 %v1954_v31  ;;  %v2348_v31 = vld [vmem:[%s3484_s9 + $0x10] sm:$0xff] }
 0xa58   : > { %2037 = vrot.lane.b32.xlu0 %v3182_v11, %s3024_s17  ;;  %s2572_s17 = sshll.u32 %s432_s23, 4 }
 0xa59   : > { %s434_s21 = scalar_lea.vmem [#allocation2], %s2572_s17 }
 0xa5a   : > { %s2506_s22 = sshll.u32 %s434_s21, 4  ;;  %s3431_s22 = int_to_ptr.vmem [resolvable:$true] %s2506_s22 }
 0xa5b   : > { %s2950_s17 = scalar_lea.vmem %s3431_s22, 256  ;;  %p2957_p0 = scmp.lt.s32.totalorder %s3431_s22, %s2955_s1 }
 0xa5c   : > { %p2951_p11 = scmp.ne.s32.totalorder %s3431_s22, %s2950_s17  ;;  %p2958_p1 = scmp.lt.s32.totalorder %s2956_s24, %s2950_s17 }
 0xa5e   : > { %p2952_p12 = pnand %p2951_p11, %p3136_p5  ;;  %p2959_p2 = por %p2958_p1, %p2957_p0 }
 0xa60   : > { %p2953_p13 = pneg %p2952_p12 }
 0xa62   : > { %p2960_p3 = pnand %p2959_p2, %p2953_p13 }
 0xacb   : > { %v1956_v32 = vpop.xlane.xlu0 %1955 }
 0xacc   : > { %2940 = vrcp.f32 %v1956_v32  ;;  %v2346_v32 = vld [vmem:[%s3484_s9] sm:$0xff] }
 0xacf   : > { %v2038_v33 = vpop.permute.xlu0 %2037 }
 0xad0   : > { %2801 = vmatpush3.msra.mxu0 %v2038_v33  ;;  %v2613_v33 = vld [vmem:[%s3483_s8] ss:$0 sm:$0xff] }
 0xad1   : > { %2810 = vmatprep.subr.mxu0 %v2255_v58 }
 0xad9   : > { %v2941_v34 = vpop.eup %2940 }
 0xada   : > { %v1960_v35 = vmul.f32 %v2941_v34, %v2939_v30  ;;  %v2349_v30 = vld [vmem:[%s3484_s9 + $0x18] sm:$0xff] }
 0xadc   : > { %2803 = vmatmul.mubr.msk.f32.vlgmr.msra.gmra.mxu0 %vm544_vm2, %v1960_v35 }
 0xadd   : > { %2811 = vmatpush3.msra.mxu0 %v2255_v58 }
 0xade   : > { %2812 = vmatprep.subr.mxu0 %v2254_v59 }
 0xadf   : > { %2813 = vmatpush3.msra.mxu0 %v2254_v59 }
 0xae0   : > { %2814 = vmatprep.subr.mxu0 %v2253_v60 }
 0xae1   : > { %2815 = vmatpush3.msra.mxu0 %v2253_v60 }
 0xae2   : > { %2816 = vmatprep.subr.mxu0 %v2252_v61 }
 0xae3   : > { %2817 = vmatpush3.msra.mxu0 %v2252_v61 }
 0xaf4   : > { %v2033_v36 = vpop.f32.mrf.mxu1 }
 0xaf5   : > { %2807 = vmatprep.mubr.msk.f32.mxu1 %vm544_vm2, %v2033_v36 }
 0xaf6   : > { %v2799_v37 = vpop.f32.mrf.mxu1 }
 0xb9c   : > { %v2109_v38 = vpop.f32.mrf.mxu0 }
 0xb9d   : > { %2808 = vmatmul.mubr.msk.f32.vlgmr.msra.gmra.mxu1 %vm544_vm2, %v2109_v38 }
 0xb9e   : > { %v2804_v11 = vpop.f32.mrf.mxu0  ;;  %2822 = vmatpush3.msra.mxu1 %v2361_v62 }
 0xb9f   : > { %2823 = vmatprep.subr.mxu1 %v2360_v63 }
 0xba0   : > { %2824 = vmatpush3.msra.mxu1 %v2360_v63  ;;  %v2617_v63 = vld [vmem:[%s3486_s11] ss:$0 sm:$0xff] }
 0xba1   : > { %2825 = vmatprep.subr.mxu1 %v2359_v0 }
 0xba2   : > { %2826 = vmatpush3.msra.mxu1 %v2359_v0 }
 0xba3   : > { %2827 = vmatprep.subr.mxu1 %v2358_v1 }
 0xba4   : > { %2828 = vmatpush3.msra.mxu1 %v2358_v1 }
 0xba5   : > { %2829 = vmatprep.subr.mxu1 %v2357_v2 }
 0xba6   : > { %2830 = vmatpush3.msra.mxu1 %v2357_v2  ;;  %v2618_v2 = vld [vmem:[%s3487_s12] ss:$0 sm:$0xff] }
 0xba7   : > { %2831 = vmatprep.subr.mxu1 %v2356_v3 }
 0xba8   : > { %2832 = vmatpush3.msra.mxu1 %v2356_v3 }
 0xba9   : > { %2833 = vmatprep.subr.mxu1 %v2355_v7 }
 0xbaa   : > { %2834 = vmatpush3.msra.mxu1 %v2355_v7 }
 0xbab   : > { %2835 = vmatprep.subr.mxu1 %v2354_v8 }
 0xbac   : > { %2836 = vmatpush3.msra.mxu1 %v2354_v8 }
 0xbad   : > { %2837 = vmatprep.subr.mxu1 %v2353_v9 }
 0xbae   : > { %2838 = vmatpush3.msra.mxu1 %v2353_v9 }
 0xbaf   : > { %2839 = vmatprep.subr.mxu1 %v2352_v12 }
 0xbb0   : > { %2840 = vmatpush3.msra.mxu1 %v2352_v12 }
 0xbb1   : > { %2841 = vmatprep.subr.mxu1 %v2351_v13 }
 0xbb2   : > { %2842 = vmatpush3.msra.mxu1 %v2351_v13 }
 0xbb3   : > { %2843 = vmatprep.subr.mxu1 %v2350_v14 }
 0xbb4   : > { %2844 = vmatpush3.msra.mxu1 %v2350_v14 }
 0xbb5   : > { %2845 = vmatprep.subr.mxu1 %v2349_v30 }
 0xbb6   : > { %2846 = vmatpush3.msra.mxu1 %v2349_v30 }
 0xbb7   : > { %2847 = vmatprep.subr.mxu1 %v2348_v31 }
 0xbb8   : > { %2848 = vmatpush3.msra.mxu1 %v2348_v31 }
 0xbb9   : > { %2849 = vmatprep.subr.mxu1 %v2347_v10 }
 0xbba   : > { %2850 = vmatpush3.msra.mxu1 %v2347_v10 }
 0xbbb   : > { %2851 = vmatprep.subr.mxu1 %v2346_v32 }
 0xbbc   : > { %2852 = vmatpush3.msra.mxu1 %v2346_v32 }
 0xc5d   : > { %v2809_v39 = vpop.f32.mrf.mxu1 }
 0xc5e   : > { %v2195_v41 = vadd.f32 %v2809_v39, %v1780_v17  ;;  %v2616_v39 = vld [vmem:[%s3485_s10] ss:$0 sm:$0xff] }
 0xc5f   : > { %v2185_v42 = vpop.f32.mrf.mxu1 }
 0xc60   : > { %v2204_v43 = vadd.f32 %v2610_v40, %v2195_v41  ;;  %v2194_v44 = vadd.f32 %v2185_v42, %v1779_v19 }
 0xc62   : > { %v2203_v45 = vadd.f32 %v2610_v40, %v2194_v44  ;;  %v2206_v46 = vadd.f32 %v2204_v43, %v3164_v5 }
 0xc64   : > { %v2210_v47 = vsel %vm455_vm0, %v2206_v46, 0.0  ;;  %v2205_v48 = vadd.f32 %v2203_v45, %v3162_v4 }
 0xc65   : > { %2211 = vadd.xlane.f32.xlu0 %v2210_v47 }
 0xc66   : > { %v2207_v49 = vsel %vm455_vm0, %v2205_v48, 0.0 }
 0xc67   : > { %2208 = vadd.xlane.f32.xlu1 %v2207_v49 }
 0xcee   : > { %v2212_v50 = vpop.xlane.xlu0 %2211 }
 0xcef   : > { %v2215_v51 = vmul.f32 0.03125, %v2212_v50 }
 0xcf0   : > { %v2209_v52 = vpop.xlane.xlu1 %2208 }
 0xcf1   : > { %v3328_v53 = vsub.f32 %v2206_v46, %v2215_v51  ;;  %v2214_v54 = vmul.f32 0.03125, %v2209_v52 }
 0xcf3   : > { %v3330_v55 = vsub.f32 %v2205_v48, %v2214_v54  ;;  %v2219_v56 = vmul.f32 %v3328_v53, %v3328_v53 }
 0xcf5   : > { %v2223_v5 = vsel %vm455_vm0, %v2219_v56, 0.0  ;;  %v2218_v4 = vmul.f32 %v3330_v55, %v3330_v55 }
 0xcf6   : > { %2224 = vadd.xlane.f32.xlu0 %v2223_v5 }
 0xcf7   : > { %v2220_v57 = vsel %vm455_vm0, %v2218_v4, 0.0 }
 0xcf8   : > { %2221 = vadd.xlane.f32.xlu1 %v2220_v57 }
 0xd7f   : > { %v2225_v15 = vpop.xlane.xlu0 %2224 }
 0xd80   : > { %v2227_v16 = vmul.f32 0.03125, %v2225_v15 }
 0xd81   : > { %v2222_v17 = vpop.xlane.xlu1 %2221 }
 0xd82   : > { %v2229_v18 = vadd.f32 1e-05, %v2227_v16  ;;  %v2226_v19 = vmul.f32 0.03125, %v2222_v17 }
 0xd84   : > { %2942 = vrsqrt.f32 %v2229_v18  ;;  %v2228_v20 = vadd.f32 1e-05, %v2226_v19 }
 0xd86   : > { %2944 = vrsqrt.f32 %v2228_v20 }
 0xd91   : > { %v2943_v6 = vpop.eup %2942 }
 0xd92   : > { %v2233_v21 = vmul.f32 %v2943_v6, %v3328_v53 }
 0xd93   : > { %v2945_v25 = vpop.eup %2944 }
 0xd94   : > { %v2232_v26 = vmul.f32 %v2945_v25, %v3330_v55  ;;  %v2242_v22 = vmul.f32 %v2611_v24, %v2233_v21 }
 0xd96   : > { %v2241_v27 = vmul.f32 %v2611_v24, %v2232_v26  ;;  %v2251_v23 = vadd.f32 %v2612_v28, %v2242_v22 }
 0xd98   : > { %v2250_v29 = vadd.f32 %v2612_v28, %v2241_v27 }
 0xd9a   : > { %2818 = vmatprep.mubr.msk.f32.mxu0 %vm455_vm0, %v2250_v29 }
 0xd9b   : > { %2819 = vmatmul.mubr.msk.f32.vlgmr.msra.gmra.mxu0 %vm455_vm0, %v2251_v23 }
 0xe5b   : > { %v2820_v34 = vpop.f32.mrf.mxu0 }
 0xe5c   : > { %v2341_v35 = vadd.f32 %v2820_v34, %v2613_v33 }
 0xe5d   : > { %v2335_v36 = vpop.f32.mrf.mxu0 }
 0xe5e   : > { %v2336_v37 = vadd.f32 %v2613_v33, %v2335_v36  ;;  %v2345_v11 = vmax.f32 %v2341_v35, 0.0 }
 0xe60   : > { %v2344_v38 = vmax.f32 %v2336_v37, 0.0 }
 0xe62   : > { %2853 = vmatprep.mubr.f32.mxu1 %v2344_v38 }
 0xe63   : > { %2854 = vmatmul.mubr.f32.vlgmr.msra.gmra.mxu1 %v2345_v11 }
 0xf23   : > { %v2855_v40 = vpop.f32.mrf.mxu1 }
 0xf24   : > { %v2441_v41 = vadd.f32 %v2855_v40, %v2616_v39 }
 0xf25   : > { %v2435_v42 = vpop.f32.mrf.mxu1 }
 0xf26   : > { %v2436_v43 = vadd.f32 %v2616_v39, %v2435_v42  ;;  %v2445_v44 = vadd.f32 %v2441_v41, %v2251_v23 }
 0xf28   : > { %v2449_v45 = vsel %vm455_vm0, %v2445_v44, 0.0  ;;  %v2444_v46 = vadd.f32 %v2436_v43, %v2250_v29 }
 0xf29   : > { %2450 = vadd.xlane.f32.xlu0 %v2449_v45 }
 0xf2a   : > { %v2446_v47 = vsel %vm455_vm0, %v2444_v46, 0.0 }
 0xf2b   : > { %2447 = vadd.xlane.f32.xlu1 %v2446_v47 }
 0xfb2   : > { %v2451_v48 = vpop.xlane.xlu0 %2450 }
 0xfb3   : > { %v2453_v49 = vmul.f32 0.03125, %v2451_v48 }
 0xfb4   : > { %v2448_v50 = vpop.xlane.xlu1 %2447 }
 0xfb5   : > { %v2455_v51 = vsub.f32 %v2445_v44, %v2453_v49  ;;  %v2452_v52 = vmul.f32 0.03125, %v2448_v50 }
 0xfb7   : > { %v2454_v53 = vsub.f32 %v2444_v46, %v2452_v52  ;;  %v2457_v54 = vmul.f32 %v2455_v51, %v2455_v51 }
 0xfb9   : > { %v2461_v55 = vsel %vm455_vm0, %v2457_v54, 0.0  ;;  %v2456_v56 = vmul.f32 %v2454_v53, %v2454_v53 }
 0xfba   : > { %2462 = vadd.xlane.f32.xlu0 %v2461_v55 }
 0xfbb   : > { %v2458_v5 = vsel %vm455_vm0, %v2456_v56, 0.0 }
 0xfbc   : > { %2459 = vadd.xlane.f32.xlu1 %v2458_v5 }
0x1043   : > { %v2463_v4 = vpop.xlane.xlu0 %2462 }
0x1044   : > { %v2465_v57 = vmul.f32 0.03125, %v2463_v4 }
0x1045   : > { %v2460_v58 = vpop.xlane.xlu1 %2459 }
0x1046   : > { %v2467_v59 = vadd.f32 1e-05, %v2465_v57  ;;  %v2464_v60 = vmul.f32 0.03125, %v2460_v58 }
0x1048   : > { %2946 = vrsqrt.f32 %v2467_v59  ;;  %v2466_v61 = vadd.f32 1e-05, %v2464_v60 }
0x104a   : > { %2948 = vrsqrt.f32 %v2466_v61 }
0x1055   : > { %v2947_v62 = vpop.eup %2946 }
0x1056   : > { %v2471_v0 = vmul.f32 %v2947_v62, %v2455_v51 }
0x1057   : > { %v2949_v1 = vpop.eup %2948 }
0x1058   : > { %v2480_v3 = vmul.f32 %v2617_v63, %v2471_v0  ;;  %v2470_v7 = vmul.f32 %v2949_v1, %v2454_v53 }
0x105a   : > { %v2479_v8 = vmul.f32 %v2617_v63, %v2470_v7  ;;  %v2489_v9 = vadd.f32 %v2618_v2, %v2480_v3 }
0x105c   : > { %v2488_v12 = vadd.f32 %v2618_v2, %v2479_v8  ;;  %2491 = vst.msk [vmem:[%s434_s21 + $0x8] sm:$0xff] %vm455_vm0, %v2489_v9 }
0x105e   : > { %2490 = vst.msk [vmem:[%s434_s21] sm:$0xff] %vm455_vm0, %v2488_v12 }
0x105f   : > { %2963 = shalt.err (!%p2960_p3)
}
0x1060   : > { %s2964_s23 = scalar_lea.hbm %s3429_s2, 256  ;;  %s2968_s16 = scalar_lea.hbm %s3488_s13, 512 }
0x1061   : > { %p2965_p4 = scmp.ne.s32.totalorder %s3429_s2, %s2964_s23  ;;  %p2969_p9 = scmp.lt.s32.totalorder %s3429_s2, %s3488_s13 }
0x1062   : > { %p2970_p10 = scmp.lt.s32.totalorder %s2968_s16, %s2964_s23 }
0x1063   : > { %p2966_p7 = pnand %p2965_p4, %p3136_p5 }
0x1064   : > { %p2971_p11 = por %p2970_p10, %p2969_p9 }
0x1065   : > { %p2967_p8 = pneg %p2966_p7 }
0x1067   : > { %p2972_p12 = pnand %p2971_p11, %p2967_p8 }
0x1069   : > { %2975 = shalt.err (!%p2972_p12)
}
0x106a   : > { %s3026_s17 = smov 128   ;;  %s3027_s0 = smov 8  }
0x106b   : > { %2856 = dma.vmem_to_hbm [thread:$0]  (%p3136_p5), %s3431_s22, 256, %s3429_s2, %s3435_s29, %s3026_s17, %s3026_s17, %s3027_s0  }
0x106c PF: > { %p2862_p13 = scmp.ge.s32.totalorder %s3010_s28, 2  ;;  %s2521_s1 = sand.u32 1, %s2998_s25  }
0x106d   : > { %s2522_s24 = scalar_lea.sflag [#allocation3], %s2521_s1 }
0x106e   : > { %p2859_p0 = pnand %p2862_p13, %p3140_p6 }
0x1070   : > { %p2860_p1 = pneg %p2859_p0 }
0x1072   : > { %2993 = dma.done.wait (%p2860_p1), %s2522_s24, 256  }
0x1073   : > { %2995 = vsyncadd (%p2860_p1), %s2522_s24, 4294967040  ;;  %s3498_s23 = sld [smem:[#allocation5_spill]]  ;;  %p23_p2 = scmp.ge.s32.totalorder %s3123_s14, 4  }
0x1074   : > { %s3499_s25 = smov %s3002_s26  ;;  %s3500_s26 = smov %s3006_s27 }
0x1075   : > { %s3502_s28 = smov %s3123_s14  ;;  %25 = sbr.rel (!%p23_p2) target bundleno = 7 (0x7), region = 107 }
0x1079   : > { %s3501_s27 = smov %s3498_s23 }
0x107a   :  { %2527 = vsyncpa [#allocation3], 1 }
0x107b   :  { %2529 = vsyncpa [#allocation3 + $0x1], 1 }

</bundles_post_ra>
